<compile_context>
chip_gen: v7x
topology: tpu7x:2x2x1
jax: 0.10.0
libtpu: 0.0.40
codegen_flags: <defaults>
</compile_context>

<pallas_src>
import jax
import jax.numpy as jnp
from jax import lax
from jax.experimental import pallas as pl
from jax.experimental.pallas import tpu as pltpu


def _round_up(x: int, m: int) -> int:
    return (x + m - 1) // m * m


def _choose_tiles(M: int, K: int, N: int):
    # tm multiple of 8, tn/tk multiples of 128; capped for VMEM portability.
    tm = min(128, _round_up(M, 8))
    tn = min(256, _round_up(N, 128))
    tk = min(512, _round_up(K, 128))
    return tm, tn, tk


def linear_kernel(x_ref, w_ref, b_ref, o_ref, acc_ref):
    # x_ref:   (tm, tk)  VMEM   activation tile
    # w_ref:   (tn, tk)  VMEM   weight tile in PyTorch [D_out, D_in] layout
    # b_ref:   (1, tn)   VMEM   bias tile
    # o_ref:   (tm, tn)  VMEM   output tile (resident across K axis)
    # acc_ref: (tm, tn)  VMEM   f32 accumulator scratch
    k = pl.program_id(2)

    @pl.when(k == 0)
    def _():
        acc_ref[...] = jnp.zeros_like(acc_ref)

    # Contract dim 1 of both operands: x[tm,tk] . w[tn,tk]^T -> [tm,tn] on the MXU.
    acc_ref[...] += lax.dot_general(
        x_ref[...],
        w_ref[...],
        dimension_numbers=(((1,), (1,)), ((), ())),
        preferred_element_type=jnp.float32,
    )

    @pl.when(k == pl.num_programs(2) - 1)
    def _():
        o_ref[...] = (acc_ref[...] + b_ref[...]).astype(o_ref.dtype)


def logistic_regression_forward(x, weight, bias):
    """x: [B, D_in], weight: [D_out, D_in] (PyTorch layout), bias: [D_out] -> [B, D_out]."""
    B, D_in = x.shape
    D_out, _ = weight.shape

    tm, tn, tk = _choose_tiles(B, D_in, D_out)
    Mp, Kp, Np = _round_up(B, tm), _round_up(D_in, tk), _round_up(D_out, tn)

    # Zero-pad to tile multiples (no-op for already-aligned shapes).
    if (Mp, Kp) != (B, D_in):
        x = jnp.pad(x, ((0, Mp - B), (0, Kp - D_in)))
    if (Np, Kp) != (D_out, D_in):
        weight = jnp.pad(weight, ((0, Np - D_out), (0, Kp - D_in)))
    if Np != D_out:
        bias = jnp.pad(bias, (0, Np - D_out))
    b2 = bias.reshape(1, Np)

    grid = (Mp // tm, Np // tn, Kp // tk)

    cost = pl.CostEstimate(
        flops=2 * Mp * Np * Kp,
        transcendentals=0,
        bytes_accessed=4 * (Mp * Kp + Np * Kp + Mp * Np + Np),
    )

    out = pl.pallas_call(
        linear_kernel,
        out_shape=jax.ShapeDtypeStruct((Mp, Np), x.dtype),
        grid_spec=pltpu.PrefetchScalarGridSpec(
            num_scalar_prefetch=0,
            grid=grid,
            in_specs=[
                pl.BlockSpec((tm, tk), lambda i, j, k: (i, k)),  # x tile
                pl.BlockSpec((tn, tk), lambda i, j, k: (j, k)),  # weight tile (no transpose)
                pl.BlockSpec((1, tn), lambda i, j, k: (0, j)),   # bias tile
            ],
            out_specs=pl.BlockSpec((tm, tn), lambda i, j, k: (i, j)),
            scratch_shapes=[pltpu.VMEM((tm, tn), jnp.float32)],
        ),
        compiler_params=pltpu.CompilerParams(
            dimension_semantics=("parallel", "parallel", "arbitrary"),
            vmem_limit_bytes=32 * 1024 * 1024,
        ),
        cost_estimate=cost,
    )(x, weight, b2)

    if (Mp, Np) != (B, D_out):
        out = out[:B, :D_out]
    return out


if __name__ == "__main__":
    # Small shapes consistent with the module: Linear(input_dim, output_dim)
    B, D_in, D_out = 8, 256, 128

    key = jax.random.PRNGKey(0)
    kx, kw, kb = jax.random.split(key, 3)

    x = jax.random.normal(kx, (B, D_in), dtype=jnp.float32)
    # PyTorch-style uniform(-1/sqrt(fan_in), 1/sqrt(fan_in)) init
    bound = 1.0 / (D_in ** 0.5)
    weight = jax.random.uniform(kw, (D_out, D_in), jnp.float32, -bound, bound)
    bias = jax.random.uniform(kb, (D_out,), jnp.float32, -bound, bound)

    out = logistic_regression_forward(x, weight, bias)
    out = jax.block_until_ready(out)

    # Reference check against plain JAX
    ref = x @ weight.T + bias
    assert out.shape == (B, D_out)
    assert jnp.allclose(out, ref, atol=1e-5, rtol=1e-5)

    print("KERNEL_OK")
</pallas_src>

<mosaic_0001>
module attributes {stable_mosaic.version = 11 : i64} {
  func.func @linear_kernel(%arg0: i32, %arg1: i32, %arg2: i32, %arg3: memref<8x256xf32, #tpu.memory_space<vmem>>, %arg4: memref<128x256xf32, #tpu.memory_space<vmem>>, %arg5: memref<1x128xf32, #tpu.memory_space<vmem>>, %arg6: memref<8x128xf32, #tpu.memory_space<vmem>>, %arg7: memref<8x128xf32, #tpu.memory_space<vmem>>) attributes {dimension_semantics = [#tpu.dimension_semantics<parallel>, #tpu.dimension_semantics<parallel>, #tpu.dimension_semantics<arbitrary>], iteration_bounds = array<i64: 1, 1, 1>, scalar_prefetch = 0 : i64, scratch_operands = 1 : i64, tpu.core_type = #tpu.core_type<tc>, window_params = [{transform_indices = @transform_0, window_bounds = array<i64: 8, 256>}, {transform_indices = @transform_1, window_bounds = array<i64: 128, 256>}, {transform_indices = @transform_2, window_bounds = array<i64: 1, 128>}, {transform_indices = @transform_3, window_bounds = array<i64: 8, 128>}]} {
    %c0_i32 = arith.constant 0 : i32
    %0 = arith.cmpi eq, %arg2, %c0_i32 : i32
    %1 = arith.extui %0 : i1 to i32
    %c0_i32_0 = arith.constant 0 : i32
    %2 = arith.cmpi ne, %1, %c0_i32_0 : i32
    scf.if %2 {
      %cst_10 = arith.constant 0.000000e+00 : f32
      %12 = vector.broadcast %cst_10 : f32 to vector<8x128xf32>
      %c0_11 = arith.constant 0 : index
      %c0_12 = arith.constant 0 : index
      %13 = vector.load %arg7[%c0_11, %c0_12] : memref<8x128xf32, #tpu.memory_space<vmem>>, vector<8x128xf32>
      tpu.vector_store %arg7[%c0_11, %c0_12], %12 {strides = array<i32>} : memref<8x128xf32, #tpu.memory_space<vmem>>, vector<8x128xf32>,
    } else {
    }
    %c0 = arith.constant 0 : index
    %c0_1 = arith.constant 0 : index
    %3 = vector.load %arg7[%c0, %c0_1] : memref<8x128xf32, #tpu.memory_space<vmem>>, vector<8x128xf32>
    %c0_2 = arith.constant 0 : index
    %c0_3 = arith.constant 0 : index
    %4 = vector.load %arg3[%c0_2, %c0_3] : memref<8x256xf32, #tpu.memory_space<vmem>>, vector<8x256xf32>
    %c0_4 = arith.constant 0 : index
    %c0_5 = arith.constant 0 : index
    %5 = vector.load %arg4[%c0_4, %c0_5] : memref<128x256xf32, #tpu.memory_space<vmem>>, vector<128x256xf32>
    %cst = arith.constant dense<0.000000e+00> : vector<8x128xf32>
    %6 = tpu.matmul %4, %5, %cst {dimension_numbers = #tpu.dot_dimension_numbers<[1], [1], [0], [0], [0, 0, 1, 0], [], []>} : vector<8x256xf32>, vector<128x256xf32>, vector<8x128xf32> -> vector<8x128xf32>
    %7 = arith.addf %3, %6 : vector<8x128xf32>
    %c0_6 = arith.constant 0 : index
    %c0_7 = arith.constant 0 : index
    %8 = vector.load %arg7[%c0_6, %c0_7] : memref<8x128xf32, #tpu.memory_space<vmem>>, vector<8x128xf32>
    tpu.vector_store %arg7[%c0_6, %c0_7], %7 {strides = array<i32>} : memref<8x128xf32, #tpu.memory_space<vmem>>, vector<8x128xf32>,
    %c0_i32_8 = arith.constant 0 : i32
    %9 = arith.cmpi eq, %arg2, %c0_i32_8 : i32
    %10 = arith.extui %9 : i1 to i32
    %c0_i32_9 = arith.constant 0 : i32
    %11 = arith.cmpi ne, %10, %c0_i32_9 : i32
    scf.if %11 {
      %c0_10 = arith.constant 0 : index
      %c0_11 = arith.constant 0 : index
      %12 = vector.load %arg7[%c0_10, %c0_11] : memref<8x128xf32, #tpu.memory_space<vmem>>, vector<8x128xf32>
      %c0_12 = arith.constant 0 : index
      %c0_13 = arith.constant 0 : index
      %13 = vector.load %arg5[%c0_12, %c0_13] : memref<1x128xf32, #tpu.memory_space<vmem>>, vector<1x128xf32>
      %14 = vector.broadcast %13 : vector<1x128xf32> to vector<8x128xf32>
      %15 = arith.addf %12, %14 : vector<8x128xf32>
      %c0_14 = arith.constant 0 : index
      %c0_15 = arith.constant 0 : index
      %16 = vector.load %arg6[%c0_14, %c0_15] : memref<8x128xf32, #tpu.memory_space<vmem>>, vector<8x128xf32>
      tpu.vector_store %arg6[%c0_14, %c0_15], %15 {strides = array<i32>} : memref<8x128xf32, #tpu.memory_space<vmem>>, vector<8x128xf32>,
    } else {
    }
    return
  }
  func.func @transform_0(%arg0: i32, %arg1: i32, %arg2: i32) -> (i32, i32) {
    %c0_i32 = arith.constant 0 : i32
    return %arg0, %arg2 : i32, i32
  }
  func.func @transform_1(%arg0: i32, %arg1: i32, %arg2: i32) -> (i32, i32) {
    %c0_i32 = arith.constant 0 : i32
    return %arg1, %arg2 : i32, i32
  }
  func.func @transform_2(%arg0: i32, %arg1: i32, %arg2: i32) -> (i32, i32) {
    %c0_i32 = arith.constant 0 : i32
    %c0_i32_0 = arith.constant 0 : i32
    return %c0_i32, %arg1 : i32, i32
  }
  func.func @transform_3(%arg0: i32, %arg1: i32, %arg2: i32) -> (i32, i32) {
    %c0_i32 = arith.constant 0 : i32
    return %arg0, %arg1 : i32, i32
  }
}

</mosaic_0001>

<bundles_post_ra>
// kernel: tpu_custom_call.1
= control target key start
LH: loop header
LB: loop body
LE: loop exit
PB: predicated region body
PF: predicated region fallthrough
CT: control target
= control target key end

     0   :  { %8 = vsyncpa [#allocation4], 0  ;;  %s363_s0 = inlined_call_operand.hbm [shape: f32[8,256], index: 0, kind: input, shape index: {}]   ;;  %s364_s1 = inlined_call_operand.hbm [shape: f32[128,256], index: 1, kind: input, shape index: {}]   ;;  %s365_s2 = inlined_call_operand.vmem [shape: f32[1,128], index: 2, kind: input, shape index: {}]   ;;  %s366_s3 = inlined_call_operand.hbm [shape: f32[8,128], index: 3, kind: output, shape index: {}]  }
   0x1   :  { %9 = vsyncpa [#allocation7], 0 }
   0x2   :  { %10 = vsyncpa [#allocation5], 0  ;;  %s292_s12 = smov [#allocation3]   ;;  %s293_s14 = smov [#allocation6]  }
   0x3   :  { %s17_s13 = sshll.u32 %s292_s12, 4  ;;  %s26_s15 = sshll.u32 %s293_s14, 4  ;;  %s18_s13 = int_to_ptr.vmem [resolvable:$true] %s17_s13  ;;  %s317_s15 = int_to_ptr.vmem [resolvable:$true] %s26_s15 }
   0x4   :  { %s220_s18 = scalar_lea.hbm %s363_s0, 256 }
   0x5   :  { %p221_p0 = scmp.ne.s32.totalorder %s363_s0, %s220_s18  ;;  %p224_p1 = scmp.lt.u32.totalorder %s220_s18, %s363_s0 }
   0x7   :  { %p226_p2 = pnand %p224_p1, %p221_p0 }
   0x9   :  { %229 = shalt.err (!%p226_p2)
}
   0xa   :  { %s230_s23 = scalar_lea.vmem %s18_s13, 256  ;;  %p235_p4 = scmp.lt.s32.totalorder %s18_s13, %s18_s13 }
   0xb   :  { %p231_p3 = scmp.ne.s32.totalorder %s18_s13, %s230_s23  ;;  %p236_p5 = scmp.lt.s32.totalorder %s230_s23, %s230_s23 }
   0xd   :  { %p237_p6 = por %p236_p5, %p235_p4 }
   0xf   :  { %p238_p7 = pnand %p237_p6, %p231_p3 }
  0x11   :  { %241 = shalt.err (!%p238_p7)
}
  0x12   :  { %20 = dma.hbm_to_vmem [thread:$0]  %s363_s0, 256, %s18_s13, [#allocation4]  }
  0x13   :  { %s242_s28 = scalar_lea.hbm %s364_s1, 4096 }
  0x14   :  { %p243_p8 = scmp.ne.s32.totalorder %s364_s1, %s242_s28  ;;  %p246_p9 = scmp.lt.u32.totalorder %s242_s28, %s364_s1 }
  0x16   :  { %p248_p10 = pnand %p246_p9, %p243_p8 }
  0x18   :  { %251 = shalt.err (!%p248_p10)
}
  0x19   :  { %s252_s6 = scalar_lea.vmem %s317_s15, 4096  ;;  %p257_p12 = scmp.lt.s32.totalorder %s317_s15, %s317_s15 }
  0x1a   :  { %p253_p11 = scmp.ne.s32.totalorder %s317_s15, %s252_s6  ;;  %p258_p13 = scmp.lt.s32.totalorder %s252_s6, %s252_s6 }
  0x1c   :  { %p259_p0 = por %p258_p13, %p257_p12 }
  0x1e   :  { %p260_p1 = pnand %p259_p0, %p253_p11 }
  0x20   :  { %263 = shalt.err (!%p260_p1)
}
  0x21   :  { %s294_s0 = smov 256   ;;  %s295_s7 = smov 16  }
  0x22   :  { %32 = dma.hbm_to_vmem [thread:$0]  %s364_s1, 4096, %s317_s15, [#allocation7], %s294_s0, %s294_s0, %s295_s7  }
  0x23   :  { %286 = dma.done.wait [#allocation4], 256  }
  0x24   :  { %287 = vsyncadd [#allocation4], 4294967040 }
  0x25   :  { %288 = dma.done.wait [#allocation7], 4096  }
  0x26   :  { %289 = vsyncadd [#allocation7], 4294963200  ;;  %v50_v0 = vld [vmem:[#allocation6 + $0x8] sm:$0xff]  ;;  %v52_v1 = vld [vmem:[#allocation6 + $0x18] sm:$0xff]  ;;  %s296_s11 = smov [#allocation8]  }
  0x27   :  { %v49_v2 = vld [vmem:[#allocation6] sm:$0xff]  ;;  %v183_v3 = vpack.c.bf16 %v52_v1, %v50_v0  ;;  %v51_v4 = vld [vmem:[#allocation6 + $0x10] sm:$0xff]  ;;  %v54_v5 = vld [vmem:[#allocation6 + $0x28] sm:$0xff]  ;;  %s172_s12 = sshll.u32 %s296_s11, 4  ;;  %s173_s12 = int_to_ptr.vmem [resolvable:$true] %s172_s12 }
  0x28   :  { %v56_v6 = vld [vmem:[#allocation6 + $0x38] sm:$0xff]  ;;  %v185_v7 = vpack.c.bf16 %v51_v4, %v49_v2  ;;  %v53_v9 = vld [vmem:[#allocation6 + $0x20] sm:$0xff]  ;;  %v55_v10 = vld [vmem:[#allocation6 + $0x30] sm:$0xff]  ;;  %s264_s13 = scalar_lea.vmem %s173_s12, 128  ;;  %p269_p3 = scmp.lt.s32.totalorder %s173_s12, %s173_s12 }
  0x29   :  { %v187_v8 = vpack.c.bf16 %v56_v6, %v54_v5  ;;  %184 = vmatprep.subr.bf16.mxu0 %v183_v3  ;;  %v58_v11 = vld [vmem:[#allocation6 + $0x48] sm:$0xff]  ;;  %v60_v12 = vld [vmem:[#allocation6 + $0x58] sm:$0xff]  ;;  %v189_v13 = vpack.c.bf16 %v55_v10, %v53_v9  ;;  %v57_v16 = vld [vmem:[#allocation6 + $0x40] sm:$0xff]  ;;  %p265_p2 = scmp.ne.s32.totalorder %s173_s12, %s264_s13  ;;  %p270_p4 = scmp.lt.s32.totalorder %s264_s13, %s264_s13 }
  0x2a   :  { %186 = vmatpush1.bf16.xpose.msra.mxu0 %v185_v7  ;;  %v191_v14 = vpack.c.bf16 %v60_v12, %v58_v11  ;;  %v48_v15 = vld [vmem:[#allocation3 + $0x8] sm:$0xff]  ;;  %v59_v17 = vld [vmem:[#allocation6 + $0x50] sm:$0xff]  ;;  %v62_v18 = vld [vmem:[#allocation6 + $0x68] sm:$0xff] }
  0x2b   :  { %188 = vmatprep.subr.bf16.mxu0 %v187_v8  ;;  %145 = vmatprep.mubr.f32.mxu0 %v48_v15  ;;  %v64_v19 = vld [vmem:[#allocation6 + $0x78] sm:$0xff]  ;;  %v193_v20 = vpack.c.bf16 %v59_v17, %v57_v16  ;;  %v61_v22 = vld [vmem:[#allocation6 + $0x60] sm:$0xff]  ;;  %v63_v23 = vld [vmem:[#allocation6 + $0x70] sm:$0xff]  ;;  %p271_p5 = por %p270_p4, %p269_p3 }
  0x2c   :  { %v195_v21 = vpack.c.bf16 %v64_v19, %v62_v18  ;;  %v66_v24 = vld [vmem:[#allocation6 + $0x88] sm:$0xff]  ;;  %v68_v25 = vld [vmem:[#allocation6 + $0x98] sm:$0xff]  ;;  %v197_v26 = vpack.c.bf16 %v63_v23, %v61_v22  ;;  %v65_v28 = vld [vmem:[#allocation6 + $0x80] sm:$0xff] }
  0x2d   :  { %v199_v27 = vpack.c.bf16 %v68_v25, %v66_v24  ;;  %v67_v29 = vld [vmem:[#allocation6 + $0x90] sm:$0xff]  ;;  %v70_v30 = vld [vmem:[#allocation6 + $0xa8] sm:$0xff]  ;;  %v72_v31 = vld [vmem:[#allocation6 + $0xb8] sm:$0xff]  ;;  %p272_p6 = pnand %p271_p5, %p265_p2 }
  0x2e   :  { %v201_v32 = vpack.c.bf16 %v67_v29, %v65_v28  ;;  %v203_v33 = vpack.c.bf16 %v72_v31, %v70_v30  ;;  %v69_v34 = vld [vmem:[#allocation6 + $0xa0] sm:$0xff]  ;;  %v71_v35 = vld [vmem:[#allocation6 + $0xb0] sm:$0xff]  ;;  %v74_v36 = vld [vmem:[#allocation6 + $0xc8] sm:$0xff] }
  0x2f   :  { %v76_v37 = vld [vmem:[#allocation6 + $0xd8] sm:$0xff]  ;;  %v205_v38 = vpack.c.bf16 %v71_v35, %v69_v34  ;;  %v73_v40 = vld [vmem:[#allocation6 + $0xc0] sm:$0xff]  ;;  %v75_v41 = vld [vmem:[#allocation6 + $0xd0] sm:$0xff] }
  0x30   :  { %v207_v39 = vpack.c.bf16 %v76_v37, %v74_v36  ;;  %v78_v42 = vld [vmem:[#allocation6 + $0xe8] sm:$0xff]  ;;  %v80_v43 = vld [vmem:[#allocation6 + $0xf8] sm:$0xff]  ;;  %v209_v44 = vpack.c.bf16 %v75_v41, %v73_v40  ;;  %v77_v46 = vld [vmem:[#allocation6 + $0xe0] sm:$0xff] }
  0x31   :  { %v211_v45 = vpack.c.bf16 %v80_v43, %v78_v42  ;;  %v79_v47 = vld [vmem:[#allocation6 + $0xf0] sm:$0xff] }
  0x32   :  { %190 = vmatpush1.bf16.xpose.msra.mxu0 %v189_v13  ;;  %v213_v48 = vpack.c.bf16 %v79_v47, %v77_v46  ;;  %v47_v49 = vld [vmem:[#allocation3] sm:$0xff] }
  0x33   :  { %192 = vmatprep.subr.bf16.mxu0 %v191_v14  ;;  %v182_v50 = vld [vmem:[%s365_s2] ss:$0 sm:$0xff] }
  0x3a   :  { %194 = vmatpush1.bf16.xpose.msra.mxu0 %v193_v20 }
  0x3b   :  { %196 = vmatprep.subr.bf16.mxu0 %v195_v21 }
  0x42   :  { %198 = vmatpush1.bf16.xpose.msra.mxu0 %v197_v26 }
  0x43   :  { %200 = vmatprep.subr.bf16.mxu0 %v199_v27 }
  0x4a   :  { %202 = vmatpush1.bf16.xpose.msra.mxu0 %v201_v32 }
  0x4b   :  { %204 = vmatprep.subr.bf16.mxu0 %v203_v33 }
  0x52   :  { %206 = vmatpush1.bf16.xpose.msra.mxu0 %v205_v38 }
  0x53   :  { %208 = vmatprep.subr.bf16.mxu0 %v207_v39 }
  0x5a   :  { %210 = vmatpush1.bf16.xpose.msra.mxu0 %v209_v44 }
  0x5b   :  { %212 = vmatprep.subr.bf16.mxu0 %v211_v45 }
  0x62   :  { %214 = vmatpush1.bf16.xpose.msra.mxu0 %v213_v48 }
  0x69   :  { %146 = vmatmul.mubr.f32.vlgmr.msra.gmra.mrb[0].mxu0 %v47_v49 }
 0x13c   :  { %v147_v51 = vpop.f32.mrb[0].mxu0 }
 0x13d   :  { %v164_v52 = vadd.f32 %v182_v50, %v147_v51  ;;  %v149_v53 = vpop.f32.mrb[1].mxu0 }
 0x13f   :  { %165 = vst [vmem:[#allocation8] sm:$0xff] %v164_v52 }
 0x140   :  { %275 = shalt.err (!%p272_p6)
}
 0x141   :  { %s276_s16 = scalar_lea.hbm %s366_s3, 128 }
 0x142   :  { %p277_p7 = scmp.ne.s32.totalorder %s366_s3, %s276_s16  ;;  %p280_p8 = scmp.lt.u32.totalorder %s276_s16, %s366_s3 }
 0x144   :  { %p282_p9 = pnand %p280_p8, %p277_p7 }
 0x146   :  { %285 = shalt.err (!%p282_p9)
}
 0x147   :  { %175 = dma.vmem_to_hbm [thread:$0]  %s173_s12, 128, %s366_s3, [#allocation5]  }
 0x148   :  { %290 = dma.done.wait [#allocation5], 128  }
 0x149   :  { %291 = vsyncadd [#allocation5], 4294967168 }
 0x14a   :  { %179 = vsyncpa [#allocation4], 1 }
 0x14b   :  { %180 = vsyncpa [#allocation7], 1 }
 0x14c   :  { %181 = vsyncpa [#allocation5], 1 }

</bundles_post_ra>
